<compile_context>
chip_gen: v7x
topology: tpu7x:2x2x1
jax: 0.10.0
libtpu: 0.0.40
codegen_flags: <defaults>
</compile_context>

<pallas_src>
import math

import jax
import jax.numpy as jnp
from jax.experimental import pallas as pl
from jax.experimental.pallas import tpu as pltpu

# ---------------------------------------------------------------------------
# "arch" config constants (from the original SPACE config).
# ---------------------------------------------------------------------------
FIX_ALPHA_STEPS = 0          # branch `global_step < fix_alpha_steps` disabled
FIX_ALPHA_VALUE = 0.1
FG_SIGMA = 0.15
BG_SIGMA = 0.15

# dtype used to stream fg / bg from their producers into the kernel.  Set to
# jnp.float32 to recover exact f32 forward semantics; bf16 halves their HBM
# traffic while all in-kernel compute stays f32.
STREAM_DTYPE = jnp.bfloat16

_LN_2PI = math.log(2.0 * math.pi)


# ---------------------------------------------------------------------------
# Pallas kernel: fused likelihoods + mixing + logsumexp + composite + reductions
# ---------------------------------------------------------------------------
def _space_fuse_kernel(x_ref, fg_ref, bg_ref, alpha_ref, y_ref, stats_ref):
    """Per grid step block layout:
         x_ref, fg_ref, bg_ref, y_ref : (TB, C*H*W)   lanes = flattened pixels
         alpha_ref                    : (TB, H*W)     one plane per image
         stats_ref                    : (TB, 128)     lane 0 = log_like, lane 1 = mse
    """
    a = alpha_ref[...].astype(jnp.float32)                     # (TB, HW)
    # Per-pixel mixing log-weights computed ONCE (reused for every channel).
    # The shared Gaussian normalisation constant (FG_SIGMA == BG_SIGMA) is
    # factored out here and added back to the per-image scalar at the end.
    w_fg = jnp.log(a + 1e-5)                                   # (TB, HW)
    w_bg = jnp.log((1.0 - a) + 1e-5)                           # (TB, HW)
    half_inv_var = 0.5 / (FG_SIGMA * FG_SIGMA)                 # == bg value

    tb, hw = a.shape
    chw = x_ref.shape[1]
    num_c = chw // hw

    # Channel sums accumulate element-wise (cheap VALU adds); the cross-lane
    # reductions happen ONCE after the loop (2 XLU reduces instead of 2*num_c).
    ll_px = jnp.zeros((tb, hw), jnp.float32)
    se_px = jnp.zeros((tb, hw), jnp.float32)

    # Static (unrolled) channel loop over lane-aligned slices (stride HW).
    for c in range(num_c):
        sl = pl.ds(c * hw, hw)
        x = x_ref[:, sl].astype(jnp.float32)
        fg = fg_ref[:, sl].astype(jnp.float32)
        bg = bg_ref[:, sl].astype(jnp.float32)

        dfg = x - fg
        dbg = x - bg
        fgl = w_fg - half_inv_var * (dfg * dfg)
        bgl = w_bg - half_inv_var * (dbg * dbg)

        # 2-way logsumexp, closed form: max + log(1 + exp(-|diff|)).
        m = jnp.maximum(fgl, bgl)
        ll_px = ll_px + m + jnp.log(1.0 + jnp.exp(-jnp.abs(fgl - bgl)))

        # y = a*fg + (1-a)*bg  ==  bg + a*(fg - bg)
        y = bg + a * (fg - bg)
        y_ref[:, sl] = y.astype(y_ref.dtype)

        d = y - x
        se_px = se_px + d * d

    gauss_const = -0.5 * _LN_2PI - math.log(FG_SIGMA)
    log_like = jnp.sum(ll_px, axis=-1, keepdims=True) + chw * gauss_const
    mse = jnp.sum(se_px, axis=-1, keepdims=True)

    # Lane-dense stats store: one full 128-lane vreg per row (lane 0 / lane 1
    # carry the two scalars) instead of a 2-lane ragged block.
    lane = jax.lax.broadcasted_iota(jnp.int32, stats_ref.shape, 1)
    stats_ref[...] = jnp.where(lane == 0, log_like,
                               jnp.where(lane == 1, mse, 0.0))


# ---------------------------------------------------------------------------
# Wrapper: tiling / VMEM sizing + pallas_call
# ---------------------------------------------------------------------------
def _choose_tile_batch(batch, per_img_bytes, vmem_budget_bytes=24 << 20):
    """Largest batch tile (multiple of 8) whose double-buffered working set fits
    the VMEM budget, preferring divisors of `batch` (no padding) and, when it
    costs at most a 2x tile shrink, an even grid of >= 2 steps (v7x: 2 TCs)."""
    cap = max(8, min(1024, (vmem_budget_bytes // max(per_img_bytes, 1)) // 8 * 8))
    divisors = [t for t in range(8, min(cap, batch) + 1, 8) if batch % t == 0]
    if divisors:
        tb = divisors[-1]
        multi = [t for t in divisors if (batch // t) >= 2 and (batch // t) % 2 == 0]
        if multi and 2 * multi[-1] >= tb:
            tb = multi[-1]
        return tb
    # Ragged batch: small tile keeps the padding waste <= 7 rows.
    # TODO(synk): mask the tail in-kernel instead of jnp.pad for ragged B; the
    #             pad round-trips full copies of all four tensors through HBM.
    return min(cap, 8)


def space_fuse(x, fg, bg, alpha_map):
    """x: (B, C, H, W) f32;  fg, bg: (B, C, H, W) any float (e.g. bf16);
    alpha_map: (B, 1, H, W).

    Returns y (B, C, H, W) f32, log_like (B,) f32, mse (B,) f32.
    """
    B, C, H, W = x.shape
    HW = H * W
    CHW = C * HW

    x_f = x.reshape(B, CHW).astype(jnp.float32)
    fg_f = fg.reshape(B, CHW)
    bg_f = bg.reshape(B, CHW)
    a_f = alpha_map.reshape(B, HW).astype(jnp.float32)

    # Per-image VMEM bytes per step, double-buffered in/out streams.
    bytes_img_in = (x_f.dtype.itemsize + fg_f.dtype.itemsize + bg_f.dtype.itemsize) * CHW
    per_img = 2 * (bytes_img_in + CHW * 4 + HW * 4 + 128 * 4)
    tb = _choose_tile_batch(B, per_img)

    n_blk = -(-B // tb)
    b_pad = n_blk * tb
    if b_pad != B:
        pad = ((0, b_pad - B), (0, 0))
        x_f = jnp.pad(x_f, pad)
        fg_f = jnp.pad(fg_f, pad)
        bg_f = jnp.pad(bg_f, pad)
        a_f = jnp.pad(a_f, pad)

    # Scoped VMEM: working set + headroom, capped so it also fits v7x (64 MiB/TC).
    vmem_limit = int(min(max(tb * per_img + (4 << 20), 32 << 20), 56 << 20))

    img_spec = pl.BlockSpec((tb, CHW), lambda b: (b, 0))
    alpha_spec = pl.BlockSpec((tb, HW), lambda b: (b, 0))
    stats_spec = pl.BlockSpec((tb, 128), lambda b: (b, 0))

    y_flat, stats = pl.pallas_call(
        _space_fuse_kernel,
        out_shape=(
            jax.ShapeDtypeStruct((b_pad, CHW), jnp.float32),
            jax.ShapeDtypeStruct((b_pad, 128), jnp.float32),
        ),
        grid_spec=pltpu.PrefetchScalarGridSpec(
            num_scalar_prefetch=0,
            grid=(n_blk,),
            in_specs=[img_spec, img_spec, img_spec, alpha_spec],
            out_specs=(img_spec, stats_spec),
        ),
        compiler_params=pltpu.CompilerParams(
            dimension_semantics=("parallel",),
            vmem_limit_bytes=vmem_limit,
        ),
    )(x_f, fg_f, bg_f, a_f)

    y = y_flat[:B].reshape(B, C, H, W)
    log_like = stats[:B, 0]
    mse = stats[:B, 1]
    return y, log_like, mse


# ---------------------------------------------------------------------------
# Deterministic synthetic stand-ins for SpaceBg / SpaceFg (plain JAX glue).
# They only produce fg / bg / alpha_map / KL terms; the pixel likelihoods are
# computed inside the Pallas kernel.  fg/bg are emitted in STREAM_DTYPE so XLA
# writes them to HBM at half width and the kernel reads half the bytes.
# ---------------------------------------------------------------------------
def _init_params(C=3):
    def mat(o, i, scale, shift):
        v = jnp.arange(o * i, dtype=jnp.float32).reshape(o, i)
        return scale * (v - shift)

    return {
        "w_bg": mat(C, C, 0.05, 4.0),
        "b_bg": 0.1 * jnp.arange(C, dtype=jnp.float32) - 0.1,
        "w_fg": mat(C, C, -0.04, 3.0),
        "b_fg": 0.05 * jnp.arange(C, dtype=jnp.float32),
        "w_alpha": mat(1, C, 0.2, 1.0),
        "b_alpha": jnp.array([-0.25], dtype=jnp.float32),
    }


def bg_module(x, params):
    h = jnp.einsum("oc,bchw->bohw", params["w_bg"], x) \
        + params["b_bg"][None, :, None, None]
    bg = jax.nn.sigmoid(h).astype(STREAM_DTYPE)
    kl_bg = 0.5 * jnp.sum(h.reshape(x.shape[0], -1) ** 2, axis=1) * 1e-3
    log_bg = {"bg": bg, "kl_bg": kl_bg}
    return bg, kl_bg, log_bg


def fg_module(x, params):
    h = jnp.einsum("oc,bchw->bohw", params["w_fg"], x) \
        + params["b_fg"][None, :, None, None]
    fg = jax.nn.sigmoid(h).astype(STREAM_DTYPE)
    a = jnp.einsum("oc,bchw->bohw", params["w_alpha"], x) \
        + params["b_alpha"][None, :, None, None]
    alpha_map = jax.nn.sigmoid(a)                         # (B, 1, H, W) f32
    kl_fg = 0.5 * jnp.sum(h.reshape(x.shape[0], -1) ** 2, axis=1) * 1e-3
    loss_boundary = 1e-3 * jnp.sum(alpha_map.reshape(x.shape[0], -1), axis=1)
    log_fg = {"fg": fg, "alpha_map": alpha_map, "kl_fg": kl_fg}
    return fg, alpha_map, kl_fg, loss_boundary, log_fg


# ---------------------------------------------------------------------------
# Space.forward
# ---------------------------------------------------------------------------
def space_forward(x, params, *, global_step):
    bg, kl_bg, log_bg = bg_module(x, params)
    fg, alpha_map, kl_fg, loss_boundary, log_fg = fg_module(x, params)

    # Trace-time check, mirroring the torch control flow (global_step is a
    # static Python int; with a traced step this must become lax.cond).
    if global_step and global_step < FIX_ALPHA_STEPS:
        alpha_map = jnp.full_like(alpha_map, FIX_ALPHA_VALUE)

    # Hot path fully inside Pallas: Gaussian likelihoods + alpha mixing +
    # logsumexp + composite + per-image reductions.
    y, log_like, mse = space_fuse(x, fg, bg, alpha_map)

    elbo = log_like - kl_bg - kl_fg
    loss = jnp.mean(-elbo + loss_boundary)

    log = {"imgs": x, "y": y, "mse": mse, "log_like": log_like}
    log.update(log_fg)
    log.update(log_bg)
    return loss, log


if __name__ == "__main__":
    # B=32 -> tile-batch 16 (bf16-friendly sublane packing) x 2 grid steps
    # (both v7x TensorCores busy under dimension_semantics=("parallel",)).
    B, C, H, W = 32, 3, 16, 16
    key = jax.random.PRNGKey(0)
    x = jax.random.uniform(key, (B, C, H, W), dtype=jnp.float32)
    params = _init_params(C)

    fwd = jax.jit(space_forward, static_argnames=("global_step",))
    loss, log = fwd(x, params, global_step=10000)
    jax.block_until_ready(loss)
    jax.block_until_ready(log["y"])
    jax.block_until_ready(log["mse"])
    print("KERNEL_OK")
</pallas_src>

<mosaic_0001>
module attributes {stable_mosaic.version = 11 : i64} {
  func.func @_space_fuse_kernel(%arg0: i32, %arg1: memref<16x768xf32, #tpu.memory_space<vmem>>, %arg2: memref<16x768xbf16, #tpu.memory_space<vmem>>, %arg3: memref<16x768xbf16, #tpu.memory_space<vmem>>, %arg4: memref<16x256xf32, #tpu.memory_space<vmem>>, %arg5: memref<16x768xf32, #tpu.memory_space<vmem>>, %arg6: memref<16x128xf32, #tpu.memory_space<vmem>>) attributes {dimension_semantics = [#tpu.dimension_semantics<parallel>], iteration_bounds = array<i64: 2>, scalar_prefetch = 0 : i64, scratch_operands = 0 : i64, tpu.core_type = #tpu.core_type<tc>, window_params = [{transform_indices = @transform_0, window_bounds = array<i64: 16, 768>}, {transform_indices = @transform_1, window_bounds = array<i64: 16, 768>}, {transform_indices = @transform_2, window_bounds = array<i64: 16, 768>}, {transform_indices = @transform_3, window_bounds = array<i64: 16, 256>}, {transform_indices = @transform_4, window_bounds = array<i64: 16, 768>}, {transform_indices = @transform_5, window_bounds = array<i64: 16, 128>}]} {
    %c0 = arith.constant 0 : index
    %c0_0 = arith.constant 0 : index
    %0 = vector.load %arg4[%c0, %c0_0] : memref<16x256xf32, #tpu.memory_space<vmem>>, vector<16x256xf32>
    %cst = arith.constant 9.99999974E-6 : f32
    %1 = vector.broadcast %cst : f32 to vector<16x256xf32>
    %2 = arith.addf %0, %1 : vector<16x256xf32>
    %3 = math.log %2 : vector<16x256xf32>
    %cst_1 = arith.constant 1.000000e+00 : f32
    %4 = vector.broadcast %cst_1 : f32 to vector<16x256xf32>
    %5 = arith.subf %4, %0 : vector<16x256xf32>
    %cst_2 = arith.constant 9.99999974E-6 : f32
    %6 = vector.broadcast %cst_2 : f32 to vector<16x256xf32>
    %7 = arith.addf %5, %6 : vector<16x256xf32>
    %8 = math.log %7 : vector<16x256xf32>
    %cst_3 = arith.constant 0.000000e+00 : f32
    %9 = vector.broadcast %cst_3 : f32 to vector<16x256xf32>
    %cst_4 = arith.constant 0.000000e+00 : f32
    %10 = vector.broadcast %cst_4 : f32 to vector<16x256xf32>
    %c0_5 = arith.constant 0 : index
    %c0_6 = arith.constant 0 : index
    %11 = vector.load %arg1[%c0_5, %c0_6] : memref<16x768xf32, #tpu.memory_space<vmem>>, vector<16x256xf32>
    %c0_7 = arith.constant 0 : index
    %c0_8 = arith.constant 0 : index
    %12 = vector.load %arg2[%c0_7, %c0_8] : memref<16x768xbf16, #tpu.memory_space<vmem>>, vector<16x256xbf16>
    %13 = arith.extf %12 : vector<16x256xbf16> to vector<16x256xf32>
    %c0_9 = arith.constant 0 : index
    %c0_10 = arith.constant 0 : index
    %14 = vector.load %arg3[%c0_9, %c0_10] : memref<16x768xbf16, #tpu.memory_space<vmem>>, vector<16x256xbf16>
    %15 = arith.extf %14 : vector<16x256xbf16> to vector<16x256xf32>
    %16 = arith.subf %11, %13 : vector<16x256xf32>
    %17 = arith.subf %11, %15 : vector<16x256xf32>
    %18 = arith.mulf %16, %16 : vector<16x256xf32>
    %cst_11 = arith.constant 22.2222214 : f32
    %19 = vector.broadcast %cst_11 : f32 to vector<16x256xf32>
    %20 = arith.mulf %19, %18 : vector<16x256xf32>
    %21 = arith.subf %3, %20 : vector<16x256xf32>
    %22 = arith.mulf %17, %17 : vector<16x256xf32>
    %cst_12 = arith.constant 22.2222214 : f32
    %23 = vector.broadcast %cst_12 : f32 to vector<16x256xf32>
    %24 = arith.mulf %23, %22 : vector<16x256xf32>
    %25 = arith.subf %8, %24 : vector<16x256xf32>
    %26 = arith.maximumf %21, %25 : vector<16x256xf32>
    %27 = arith.addf %9, %26 : vector<16x256xf32>
    %28 = arith.subf %21, %25 : vector<16x256xf32>
    %29 = math.absf %28 : vector<16x256xf32>
    %cst_13 = arith.constant 0.000000e+00 : f32
    %30 = vector.broadcast %cst_13 : f32 to vector<16x256xf32>
    %31 = arith.subf %30, %29 : vector<16x256xf32>
    %32 = math.exp %31 : vector<16x256xf32>
    %cst_14 = arith.constant 1.000000e+00 : f32
    %33 = vector.broadcast %cst_14 : f32 to vector<16x256xf32>
    %34 = arith.addf %33, %32 : vector<16x256xf32>
    %35 = math.log %34 : vector<16x256xf32>
    %36 = arith.addf %27, %35 : vector<16x256xf32>
    %37 = arith.subf %13, %15 : vector<16x256xf32>
    %38 = arith.mulf %0, %37 : vector<16x256xf32>
    %39 = arith.addf %15, %38 : vector<16x256xf32>
    %c0_15 = arith.constant 0 : index
    %c0_16 = arith.constant 0 : index
    %40 = vector.load %arg5[%c0_15, %c0_16] : memref<16x768xf32, #tpu.memory_space<vmem>>, vector<16x256xf32>
    tpu.vector_store %arg5[%c0_15, %c0_16], %39 {strides = array<i32>} : memref<16x768xf32, #tpu.memory_space<vmem>>, vector<16x256xf32>,
    %41 = arith.subf %39, %11 : vector<16x256xf32>
    %42 = arith.mulf %41, %41 : vector<16x256xf32>
    %43 = arith.addf %10, %42 : vector<16x256xf32>
    %c0_17 = arith.constant 0 : index
    %c256 = arith.constant 256 : index
    %44 = vector.load %arg1[%c0_17, %c256] : memref<16x768xf32, #tpu.memory_space<vmem>>, vector<16x256xf32>
    %c0_18 = arith.constant 0 : index
    %c256_19 = arith.constant 256 : index
    %45 = vector.load %arg2[%c0_18, %c256_19] : memref<16x768xbf16, #tpu.memory_space<vmem>>, vector<16x256xbf16>
    %46 = arith.extf %45 : vector<16x256xbf16> to vector<16x256xf32>
    %c0_20 = arith.constant 0 : index
    %c256_21 = arith.constant 256 : index
    %47 = vector.load %arg3[%c0_20, %c256_21] : memref<16x768xbf16, #tpu.memory_space<vmem>>, vector<16x256xbf16>
    %48 = arith.extf %47 : vector<16x256xbf16> to vector<16x256xf32>
    %49 = arith.subf %44, %46 : vector<16x256xf32>
    %50 = arith.subf %44, %48 : vector<16x256xf32>
    %51 = arith.mulf %49, %49 : vector<16x256xf32>
    %cst_22 = arith.constant 22.2222214 : f32
    %52 = vector.broadcast %cst_22 : f32 to vector<16x256xf32>
    %53 = arith.mulf %52, %51 : vector<16x256xf32>
    %54 = arith.subf %3, %53 : vector<16x256xf32>
    %55 = arith.mulf %50, %50 : vector<16x256xf32>
    %cst_23 = arith.constant 22.2222214 : f32
    %56 = vector.broadcast %cst_23 : f32 to vector<16x256xf32>
    %57 = arith.mulf %56, %55 : vector<16x256xf32>
    %58 = arith.subf %8, %57 : vector<16x256xf32>
    %59 = arith.maximumf %54, %58 : vector<16x256xf32>
    %60 = arith.addf %36, %59 : vector<16x256xf32>
    %61 = arith.subf %54, %58 : vector<16x256xf32>
    %62 = math.absf %61 : vector<16x256xf32>
    %cst_24 = arith.constant 0.000000e+00 : f32
    %63 = vector.broadcast %cst_24 : f32 to vector<16x256xf32>
    %64 = arith.subf %63, %62 : vector<16x256xf32>
    %65 = math.exp %64 : vector<16x256xf32>
    %cst_25 = arith.constant 1.000000e+00 : f32
    %66 = vector.broadcast %cst_25 : f32 to vector<16x256xf32>
    %67 = arith.addf %66, %65 : vector<16x256xf32>
    %68 = math.log %67 : vector<16x256xf32>
    %69 = arith.addf %60, %68 : vector<16x256xf32>
    %70 = arith.subf %46, %48 : vector<16x256xf32>
    %71 = arith.mulf %0, %70 : vector<16x256xf32>
    %72 = arith.addf %48, %71 : vector<16x256xf32>
    %c0_26 = arith.constant 0 : index
    %c256_27 = arith.constant 256 : index
    %73 = vector.load %arg5[%c0_26, %c256_27] : memref<16x768xf32, #tpu.memory_space<vmem>>, vector<16x256xf32>
    tpu.vector_store %arg5[%c0_26, %c256_27], %72 {strides = array<i32>} : memref<16x768xf32, #tpu.memory_space<vmem>>, vector<16x256xf32>,
    %74 = arith.subf %72, %44 : vector<16x256xf32>
    %75 = arith.mulf %74, %74 : vector<16x256xf32>
    %76 = arith.addf %43, %75 : vector<16x256xf32>
    %c0_28 = arith.constant 0 : index
    %c512 = arith.constant 512 : index
    %77 = vector.load %arg1[%c0_28, %c512] : memref<16x768xf32, #tpu.memory_space<vmem>>, vector<16x256xf32>
    %c0_29 = arith.constant 0 : index
    %c512_30 = arith.constant 512 : index
    %78 = vector.load %arg2[%c0_29, %c512_30] : memref<16x768xbf16, #tpu.memory_space<vmem>>, vector<16x256xbf16>
    %79 = arith.extf %78 : vector<16x256xbf16> to vector<16x256xf32>
    %c0_31 = arith.constant 0 : index
    %c512_32 = arith.constant 512 : index
    %80 = vector.load %arg3[%c0_31, %c512_32] : memref<16x768xbf16, #tpu.memory_space<vmem>>, vector<16x256xbf16>
    %81 = arith.extf %80 : vector<16x256xbf16> to vector<16x256xf32>
    %82 = arith.subf %77, %79 : vector<16x256xf32>
    %83 = arith.subf %77, %81 : vector<16x256xf32>
    %84 = arith.mulf %82, %82 : vector<16x256xf32>
    %cst_33 = arith.constant 22.2222214 : f32
    %85 = vector.broadcast %cst_33 : f32 to vector<16x256xf32>
    %86 = arith.mulf %85, %84 : vector<16x256xf32>
    %87 = arith.subf %3, %86 : vector<16x256xf32>
    %88 = arith.mulf %83, %83 : vector<16x256xf32>
    %cst_34 = arith.constant 22.2222214 : f32
    %89 = vector.broadcast %cst_34 : f32 to vector<16x256xf32>
    %90 = arith.mulf %89, %88 : vector<16x256xf32>
    %91 = arith.subf %8, %90 : vector<16x256xf32>
    %92 = arith.maximumf %87, %91 : vector<16x256xf32>
    %93 = arith.addf %69, %92 : vector<16x256xf32>
    %94 = arith.subf %87, %91 : vector<16x256xf32>
    %95 = math.absf %94 : vector<16x256xf32>
    %cst_35 = arith.constant 0.000000e+00 : f32
    %96 = vector.broadcast %cst_35 : f32 to vector<16x256xf32>
    %97 = arith.subf %96, %95 : vector<16x256xf32>
    %98 = math.exp %97 : vector<16x256xf32>
    %cst_36 = arith.constant 1.000000e+00 : f32
    %99 = vector.broadcast %cst_36 : f32 to vector<16x256xf32>
    %100 = arith.addf %99, %98 : vector<16x256xf32>
    %101 = math.log %100 : vector<16x256xf32>
    %102 = arith.addf %93, %101 : vector<16x256xf32>
    %103 = arith.subf %79, %81 : vector<16x256xf32>
    %104 = arith.mulf %0, %103 : vector<16x256xf32>
    %105 = arith.addf %81, %104 : vector<16x256xf32>
    %c0_37 = arith.constant 0 : index
    %c512_38 = arith.constant 512 : index
    %106 = vector.load %arg5[%c0_37, %c512_38] : memref<16x768xf32, #tpu.memory_space<vmem>>, vector<16x256xf32>
    tpu.vector_store %arg5[%c0_37, %c512_38], %105 {strides = array<i32>} : memref<16x768xf32, #tpu.memory_space<vmem>>, vector<16x256xf32>,
    %107 = arith.subf %105, %77 : vector<16x256xf32>
    %108 = arith.mulf %107, %107 : vector<16x256xf32>
    %109 = arith.addf %76, %108 : vector<16x256xf32>
    %cst_39 = arith.constant dense<0.000000e+00> : vector<16xf32>
    %110 = vector.multi_reduction <add>, %102, %cst_39 [1] : vector<16x256xf32> to vector<16xf32>
    %111 = vector.shape_cast %110 : vector<16xf32> to vector<16x1xf32>
    %cst_40 = arith.constant 751.243347 : f32
    %112 = vector.broadcast %cst_40 : f32 to vector<16x1xf32>
    %113 = arith.addf %111, %112 : vector<16x1xf32>
    %cst_41 = arith.constant dense<0.000000e+00> : vector<16xf32>
    %114 = vector.multi_reduction <add>, %109, %cst_41 [1] : vector<16x256xf32> to vector<16xf32>
    %115 = vector.shape_cast %114 : vector<16xf32> to vector<16x1xf32>
    %116 = tpu.iota {dimensions = array<i32: 1>} : vector<16x128xi32>
    %c0_i32 = arith.constant 0 : i32
    %117 = vector.broadcast %c0_i32 : i32 to vector<16x128xi32>
    %118 = arith.cmpi eq, %116, %117 : vector<16x128xi32>
    %c1_i32 = arith.constant 1 : i32
    %119 = vector.broadcast %c1_i32 : i32 to vector<16x128xi32>
    %120 = arith.cmpi eq, %116, %119 : vector<16x128xi32>
    %cst_42 = arith.constant 0.000000e+00 : f32
    %121 = vector.shape_cast %115 : vector<16x1xf32> to vector<16x1xf32>
    %122 = vector.broadcast %121 : vector<16x1xf32> to vector<16x128xf32>
    %123 = vector.broadcast %cst_42 : f32 to vector<16x128xf32>
    %124 = arith.select %120, %122, %123 : vector<16x128xi1>, vector<16x128xf32>
    %125 = vector.shape_cast %113 : vector<16x1xf32> to vector<16x1xf32>
    %126 = vector.broadcast %125 : vector<16x1xf32> to vector<16x128xf32>
    %127 = arith.select %118, %126, %124 : vector<16x128xi1>, vector<16x128xf32>
    %c0_43 = arith.constant 0 : index
    %c0_44 = arith.constant 0 : index
    %128 = vector.load %arg6[%c0_43, %c0_44] : memref<16x128xf32, #tpu.memory_space<vmem>>, vector<16x128xf32>
    tpu.vector_store %arg6[%c0_43, %c0_44], %127 {strides = array<i32>} : memref<16x128xf32, #tpu.memory_space<vmem>>, vector<16x128xf32>,
    return
  }
  func.func @transform_0(%arg0: i32) -> (i32, i32) {
    %c0_i32 = arith.constant 0 : i32
    %c0_i32_0 = arith.constant 0 : i32
    return %arg0, %c0_i32 : i32, i32
  }
  func.func @transform_1(%arg0: i32) -> (i32, i32) {
    %c0_i32 = arith.constant 0 : i32
    %c0_i32_0 = arith.constant 0 : i32
    return %arg0, %c0_i32 : i32, i32
  }
  func.func @transform_2(%arg0: i32) -> (i32, i32) {
    %c0_i32 = arith.constant 0 : i32
    %c0_i32_0 = arith.constant 0 : i32
    return %arg0, %c0_i32 : i32, i32
  }
  func.func @transform_3(%arg0: i32) -> (i32, i32) {
    %c0_i32 = arith.constant 0 : i32
    %c0_i32_0 = arith.constant 0 : i32
    return %arg0, %c0_i32 : i32, i32
  }
  func.func @transform_4(%arg0: i32) -> (i32, i32) {
    %c0_i32 = arith.constant 0 : i32
    %c0_i32_0 = arith.constant 0 : i32
    return %arg0, %c0_i32 : i32, i32
  }
  func.func @transform_5(%arg0: i32) -> (i32, i32) {
    %c0_i32 = arith.constant 0 : i32
    %c0_i32_0 = arith.constant 0 : i32
    return %arg0, %c0_i32 : i32, i32
  }
}

</mosaic_0001>

<bundles_post_ra>
// kernel: space_forward.1
= control target key start
LH: loop header
LB: loop body
LE: loop exit
PB: predicated region body
PF: predicated region fallthrough
CT: control target
= control target key end

     0   :  { %s999_s18 = smov 0   ;;  %s1437_s0 = inlined_call_operand.vmem [shape: f32[32,768], index: 0, kind: input, shape index: {}]   ;;  %s1438_s1 = inlined_call_operand.vmem [shape: bf16[32,768], index: 1, kind: input, shape index: {}]   ;;  %s1439_s2 = inlined_call_operand.vmem [shape: bf16[32,768], index: 2, kind: input, shape index: {}]   ;;  %s1440_s3 = inlined_call_operand.vmem [shape: f32[32,256], index: 3, kind: input, shape index: {}]   ;;  %s1441_s4 = inlined_call_operand.vmem [shape: f32[32,768], index: 4, kind: output, shape index: {0}]   ;;  %s1442_s5 = inlined_call_operand.vmem [shape: f32[32,128], index: 5, kind: output, shape index: {1}]  }
   0x1 LB: > { %s866_s19 = sadd.s32 4294967295, %s967_s18   ;;  %p870_p0 = scmp.ge.s32.totalorder %s967_s18, 1  ;;  %s967_s18 = sphi %s999_s18, %s16_s18  }
   0x2   : > { %p228_p1 = scmp.lt.s32.totalorder %s967_s18, 3 }
   0x4   : > { %p229_p2 = pnand %p870_p0, %p228_p1 }
   0x5   : > { %s871_s20 = sshll.u32 (!%p229_p2), %s866_s19, 1 }
   0x6   : > { %232 = sbr.rel (%p229_p2) target bundleno = 271 (0x10f), region = 36  ;;  %p282_p3 = scmp.lt.s32.totalorder (!%p229_p2), %s871_s20, 3 }
   0xd   : > { %s1444_s20 = smov (!%p282_p3, %s871_s20), 3 }
   0xe   : > { %s887_s21 = smul.u32 48, %s1444_s20  ;;  %s886_s22 = sshll.u32 %s1444_s20, 4 }
   0xf   : > { %s888_s23 = smul.u32 24, %s1444_s20  ;;  %s1015_s26 = scalar_lea.vmem %s1440_s3, %s886_s22 }
  0x10   : > { %s1022_s29 = scalar_lea.vmem %s1437_s0, %s887_s21  ;;  %v1025_v0 = vld [vmem:[%s1015_s26] sm:$0xff]  ;;  %v1028_v1 = vld [vmem:[%s1015_s26 + $0x8] sm:$0xff]  ;;  %v1088_v30 = vld [vmem:[%s1015_s26 + $0x10] sm:$0xff]  ;;  %s1169_s13 = scalar_lea.vmem %s1441_s4, %s887_s21 }
  0x11   : > { %s1033_s7 = scalar_lea.vmem %s1438_s1, %s888_s23  ;;  %s1038_s10 = scalar_lea.vmem %s1439_s2, %s888_s23  ;;  %v326_v2 = vadd.f32 1e-05, %v1025_v0  ;;  %v327_v3 = vadd.f32 1e-05, %v1028_v1  ;;  %v338_v4 = vsub.f32 1.0, %v1025_v0  ;;  %v339_v5 = vsub.f32 1.0, %v1028_v1 }
  0x12   : > { %v1045_v6 = vld [vmem:[%s1022_s29] sm:$0xff]  ;;  %v1051_v10 = vld [vmem:[%s1022_s29 + $0x8] sm:$0xff]  ;;  %v1061_v16 = vld [vmem:[%s1022_s29 + $0x10] sm:$0xff]  ;;  %v1097_v35 = vadd.f32 1e-05, %v1088_v30  ;;  %v340_v45 = vsub.f32 1.0, %v1088_v30 }
  0x13   : > { %v1048_v7 = vld [vmem:[%s1033_s7] sm:$0xff]  ;;  %897 = vlog2.f32 %v326_v2  ;;  %v342_v8 = vadd.f32 1e-05, %v338_v4  ;;  %v343_v9 = vadd.f32 1e-05, %v339_v5  ;;  %v1064_v17 = vld [vmem:[%s1033_s7 + $0x8] sm:$0xff] }
  0x14   : > { %v360_v11 = vunpack.c.l.bf16 %v1048_v7  ;;  %v364_v12 = vld [vmem:[%s1038_s10] sm:$0xff]  ;;  %899 = vlog2.f32 %v327_v3  ;;  %v361_v13 = vunpack.c.h.bf16 %v1048_v7  ;;  %v484_v18 = vld [vmem:[%s1038_s10 + $0x8] sm:$0xff]  ;;  %v1069_v20 = vld [vmem:[%s1022_s29 + $0x18] sm:$0xff]  ;;  %v480_v21 = vunpack.c.l.bf16 %v1064_v17  ;;  %s883_s14 = sshll.u32 %s1444_s20, 3 }
  0x15   : > { %v1056_v14 = vunpack.c.l.bf16 %v364_v12  ;;  %v1058_v15 = vunpack.c.h.bf16 %v364_v12  ;;  %901 = vlog2.f32 %v342_v8  ;;  %v481_v22 = vunpack.c.h.bf16 %v1064_v17  ;;  %v1094_v34 = vld [vmem:[%s1033_s7 + $0x10] sm:$0xff]  ;;  %v1105_v44 = vld [vmem:[%s1022_s29 + $0x20] sm:$0xff]  ;;  %v1109_v49 = vld [vmem:[%s1022_s29 + $0x28] sm:$0xff]  ;;  %s320_s17 = scalar_lea.vmem %s1442_s5, %s883_s14 }
  0x16   : > { %v370_v19 = vsub.f32 %v1045_v6, %v360_v11  ;;  %903 = vlog2.f32 %v343_v9  ;;  %v371_v23 = vsub.f32 %v1051_v10, %v361_v13  ;;  %v1080_v27 = vunpack.c.l.bf16 %v484_v18  ;;  %v604_v40 = vld [vmem:[%s1038_s10 + $0x10] sm:$0xff] }
  0x17   : > { %v374_v24 = vsub.f32 %v1045_v6, %v1056_v14  ;;  %v375_v25 = vsub.f32 %v1051_v10, %v1058_v15  ;;  %v1082_v28 = vunpack.c.h.bf16 %v484_v18  ;;  %v490_v29 = vsub.f32 %v1061_v16, %v480_v21 }
  0x18   : > { %v378_v26 = vmul.f32 %v370_v19, %v370_v19  ;;  %v379_v31 = vmul.f32 %v371_v23, %v371_v23  ;;  %v491_v33 = vsub.f32 %v1069_v20, %v481_v22  ;;  %v494_v37 = vsub.f32 %v1061_v16, %v1080_v27 }
  0x19   : > { %v390_v32 = vmul.f32 %v374_v24, %v374_v24  ;;  %v391_v36 = vmul.f32 %v375_v25, %v375_v25  ;;  %v495_v38 = vsub.f32 %v1069_v20, %v1082_v28  ;;  %v498_v39 = vmul.f32 %v490_v29, %v490_v29 }
  0x1a   : > { %v382_v41 = vmul.f32 22.222221, %v378_v26  ;;  %v383_v42 = vmul.f32 22.222221, %v379_v31  ;;  %v499_v43 = vmul.f32 %v491_v33, %v491_v33  ;;  %v510_v47 = vmul.f32 %v494_v37, %v494_v37 }
  0x1b   : > { %v394_v46 = vmul.f32 22.222221, %v390_v32  ;;  %v511_v48 = vmul.f32 %v495_v38, %v495_v38  ;;  %v600_v50 = vunpack.c.l.bf16 %v1094_v34  ;;  %v502_v51 = vmul.f32 22.222221, %v498_v39 }
  0x1c   : > { %v601_v52 = vunpack.c.h.bf16 %v1094_v34  ;;  %v1113_v53 = vunpack.c.l.bf16 %v604_v40  ;;  %v1115_v54 = vunpack.c.h.bf16 %v604_v40  ;;  %v395_v56 = vmul.f32 22.222221, %v391_v36 }
  0x1d   : > { %v898_v55 = vpop.eup %897  ;;  %v503_v57 = vmul.f32 22.222221, %v499_v43  ;;  %v514_v58 = vmul.f32 22.222221, %v510_v47  ;;  %v610_v59 = vsub.f32 %v1105_v44, %v600_v50  ;;  %v515_v62 = vmul.f32 22.222221, %v511_v48 }
  0x1e   : > { %v900_v60 = vpop.eup %899  ;;  %v331_v61 = vmul.f32 0.6931472, %v898_v55  ;;  %v611_v63 = vsub.f32 %v1109_v49, %v601_v52  ;;  %v614_v2 = vsub.f32 %v1105_v44, %v1113_v53  ;;  %v615_v5 = vsub.f32 %v1109_v49, %v1115_v54 }
  0x1f   : > { %v902_v3 = vpop.eup %901  ;;  %v333_v4 = vmul.f32 0.6931472, %v900_v60  ;;  %v618_v8 = vmul.f32 %v610_v59, %v610_v59  ;;  %v446_v9 = vsub.f32 %v360_v11, %v1056_v14  ;;  %v447_v40 = vsub.f32 %v361_v13, %v1058_v15 }
  0x20   : > { %v904_v12 = vpop.eup %903  ;;  %v347_v18 = vmul.f32 0.6931472, %v902_v3  ;;  %v1128_v19 = vsub.f32 %v331_v61, %v382_v41  ;;  %v1130_v23 = vsub.f32 %v331_v61, %v502_v51  ;;  %v619_v24 = vmul.f32 %v611_v63, %v611_v63 }
  0x21   : > { %v349_v25 = vmul.f32 0.6931472, %v904_v12  ;;  %v1132_v26 = vsub.f32 %v333_v4, %v383_v42  ;;  %v1134_v29 = vsub.f32 %v333_v4, %v503_v57  ;;  %v622_v31 = vmul.f32 22.222221, %v618_v8 }
  0x22   : > { %v1136_v32 = vsub.f32 %v347_v18, %v394_v46  ;;  %v1138_v33 = vsub.f32 %v347_v18, %v514_v58  ;;  %v623_v36 = vmul.f32 22.222221, %v619_v24  ;;  %v630_v37 = vmul.f32 %v614_v2, %v614_v2 }
  0x23   : > { %v1140_v11 = vsub.f32 %v349_v25, %v395_v56  ;;  %v1142_v38 = vsub.f32 %v349_v25, %v515_v62  ;;  %v631_v39 = vmul.f32 %v615_v5, %v615_v5  ;;  %v1151_v43 = vsub.f32 %v331_v61, %v622_v31 }
  0x24   : > { %v410_v41 = vsub.f32 %v1128_v19, %v1136_v32  ;;  %v530_v42 = vsub.f32 %v1130_v23, %v1138_v33  ;;  %v450_v46 = vmul.f32 %v446_v9, %v1025_v0  ;;  %v402_v47 = vmax.f32 %v1128_v19, %v1136_v32 }
  0x25   : > { %v411_v48 = vsub.f32 %v1132_v26, %v1140_v11  ;;  %v522_v7 = vmax.f32 %v1130_v23, %v1138_v33  ;;  %v531_v13 = vsub.f32 %v1134_v29, %v1142_v38  ;;  %v1162_v56 = vsub.f32 %v333_v4, %v623_v36 }
  0x26   : > { %v414_v51 = vand.u32 2147483647, %v410_v41  ;;  %v534_v55 = vand.u32 2147483647, %v530_v42  ;;  %v634_v57 = vmul.f32 22.222221, %v630_v37  ;;  %v451_v61 = vmul.f32 %v447_v40, %v1028_v1 }
  0x27   : > { %v415_v58 = vand.u32 2147483647, %v411_v48  ;;  %v535_v59 = vand.u32 2147483647, %v531_v13  ;;  %v635_v60 = vmul.f32 22.222221, %v631_v39  ;;  %v454_v3 = vadd.f32 %v450_v46, %v1056_v14 }
  0x28   : > { %v418_v62 = vsub.f32 0.0, %v414_v51  ;;  %v538_v63 = vsub.f32 0.0, %v534_v55  ;;  %v1172_v2 = vsub.f32 %v347_v18, %v634_v57  ;;  %v455_v9 = vadd.f32 %v451_v61, %v1058_v15  ;;  %v1199_v57 = vld [vmem:[%s1015_s26 + $0x18] sm:$0xff] }
  0x29   : > { %v419_v4 = vsub.f32 0.0, %v415_v58  ;;  %v539_v5 = vsub.f32 0.0, %v535_v59  ;;  %v1175_v8 = vsub.f32 %v349_v25, %v635_v60  ;;  %v403_v12 = vmax.f32 %v1132_v26, %v1140_v11  ;;  %458 = vst [vmem:[%s1169_s13] sm:$0xff] %v454_v3 }
  0x2a   : > { %v422_v24 = vmul.f32 1.442695, %v418_v62  ;;  %v542_v31 = vmul.f32 1.442695, %v538_v63  ;;  %v650_v36 = vsub.f32 %v1151_v43, %v1172_v2  ;;  %v523_v18 = vmax.f32 %v1134_v29, %v1142_v38  ;;  %459 = vst [vmem:[%s1169_s13 + $0x8] sm:$0xff] %v455_v9 }
  0x2b   : > { %v424_v37 = vmul.f32 1.442695, %v419_v4  ;;  %v544_v14 = vmul.f32 1.442695, %v539_v5  ;;  %v651_v25 = vsub.f32 %v1162_v56, %v1175_v8  ;;  %v462_v39 = vsub.f32 %v454_v3, %v1045_v6  ;;  %v1215_v3 = vld [vmem:[%s1033_s7 + $0x18] sm:$0xff] }
  0x2c   : > { %905 = vpow2.f32 %v422_v24  ;;  %v654_v15 = vand.u32 2147483647, %v650_v36  ;;  %v463_v40 = vsub.f32 %v455_v9, %v1051_v10  ;;  %v566_v42 = vsub.f32 %v480_v21, %v1080_v27  ;;  %v1235_v24 = vld [vmem:[%s1022_s29 + $0x38] sm:$0xff] }
  0x2d   : > { %907 = vpow2.f32 %v424_v37  ;;  %v655_v41 = vand.u32 2147483647, %v651_v25  ;;  %v567_v46 = vsub.f32 %v481_v22, %v1082_v28  ;;  %v466_v13 = vmul.f32 %v462_v39, %v462_v39 }
  0x2e   : > { %909 = vpow2.f32 %v542_v31  ;;  %v658_v48 = vsub.f32 0.0, %v654_v15  ;;  %v467_v51 = vmul.f32 %v463_v40, %v463_v40  ;;  %v570_v6 = vmul.f32 %v566_v42, %v1025_v0 }
  0x2f   : > { %911 = vpow2.f32 %v544_v14  ;;  %v659_v55 = vsub.f32 0.0, %v655_v41  ;;  %v571_v10 = vmul.f32 %v567_v46, %v1028_v1  ;;  %v686_v17 = vsub.f32 %v600_v50, %v1113_v53 }
  0x30   : > { %v662_v21 = vmul.f32 1.442695, %v658_v48  ;;  %v687_v22 = vsub.f32 %v601_v52, %v1115_v54  ;;  %v329_v58 = vadd.f32 1e-05, %v1199_v57  ;;  %v574_v60 = vadd.f32 %v570_v6, %v1080_v27  ;;  %v365_v52 = vld [vmem:[%s1038_s10 + $0x18] sm:$0xff] }
  0x31   : > { %v664_v59 = vmul.f32 1.442695, %v659_v55  ;;  %v575_v61 = vadd.f32 %v571_v10, %v1082_v28  ;;  %913 = vlog2.f32 %v1097_v35  ;;  %v690_v62 = vmul.f32 %v686_v17, %v1025_v0 }
  0x32   : > { %915 = vpow2.f32 %v662_v21  ;;  %v691_v63 = vmul.f32 %v687_v22, %v1028_v1  ;;  %v341_v50 = vsub.f32 1.0, %v1199_v57  ;;  %578 = vst [vmem:[%s1169_s13 + $0x10] sm:$0xff] %v574_v60  ;;  %v582_v27 = vsub.f32 %v574_v60, %v1061_v16  ;;  %v1253_v22 = vld [vmem:[%s1033_s7 + $0x20] sm:$0xff] }
  0x33   : > { %917 = vpow2.f32 %v664_v59  ;;  %579 = vst [vmem:[%s1169_s13 + $0x18] sm:$0xff] %v575_v61  ;;  %v583_v28 = vsub.f32 %v575_v61, %v1069_v20  ;;  %v344_v34 = vadd.f32 1e-05, %v340_v45  ;;  %v694_v0 = vadd.f32 %v690_v62, %v1113_v53  ;;  %v1232_v53 = vld [vmem:[%s1022_s29 + $0x30] sm:$0xff] }
  0x34   : > { %v695_v1 = vadd.f32 %v691_v63, %v1115_v54  ;;  %919 = vlog2.f32 %v329_v58  ;;  %v345_v35 = vadd.f32 1e-05, %v341_v50  ;;  %v586_v4 = vmul.f32 %v582_v27, %v582_v27 }
  0x35   : > { %v587_v5 = vmul.f32 %v583_v28, %v583_v28  ;;  %921 = vlog2.f32 %v344_v34  ;;  %v362_v9 = vunpack.c.l.bf16 %v1215_v3  ;;  %698 = vst [vmem:[%s1169_s13 + $0x20] sm:$0xff] %v694_v0  ;;  %v702_v20 = vsub.f32 %v694_v0, %v1105_v44  ;;  %v485_v34 = vld [vmem:[%s1038_s10 + $0x20] sm:$0xff] }
  0x36   : > { %v906_v16 = vpop.eup %905  ;;  %699 = vst [vmem:[%s1169_s13 + $0x28] sm:$0xff] %v695_v1  ;;  %v703_v45 = vsub.f32 %v695_v1, %v1109_v49  ;;  %923 = vlog2.f32 %v345_v35  ;;  %v363_v54 = vunpack.c.h.bf16 %v1215_v3  ;;  %v590_v37 = vadd.f32 %v586_v4, %v466_v13 }
  0x37   : > { %v908_v31 = vpop.eup %907  ;;  %v430_v36 = vadd.f32 1.0, %v906_v16  ;;  %v591_v14 = vadd.f32 %v587_v5, %v467_v51  ;;  %v1238_v25 = vunpack.c.l.bf16 %v365_v52  ;;  %v706_v40 = vmul.f32 %v702_v20, %v702_v20 }
  0x38   : > { %v910_v15 = vpop.eup %909  ;;  %v431_v39 = vadd.f32 1.0, %v908_v31  ;;  %v707_v41 = vmul.f32 %v703_v45, %v703_v45  ;;  %v1240_v44 = vunpack.c.h.bf16 %v365_v52  ;;  %v372_v46 = vsub.f32 %v1232_v53, %v362_v9  ;;  %v1259_v52 = vld [vmem:[%s1022_s29 + $0x40] sm:$0xff] }
  0x39   : > { %v912_v49 = vpop.eup %911  ;;  %925 = vlog2.f32 %v430_v36  ;;  %v550_v42 = vadd.f32 1.0, %v910_v15  ;;  %v373_v48 = vsub.f32 %v1235_v24, %v363_v54  ;;  %v710_v51 = vadd.f32 %v706_v40, %v590_v37  ;;  %v1269_v36 = vld [vmem:[%s1022_s29 + $0x48] sm:$0xff] }
  0x3a   : > { %927 = vlog2.f32 %v431_v39  ;;  %v551_v13 = vadd.f32 1.0, %v912_v49  ;;  %v711_v55 = vadd.f32 %v707_v41, %v591_v14  ;;  %v376_v10 = vsub.f32 %v1232_v53, %v1238_v25  ;;  %v1276_v40 = vld [vmem:[%s1033_s7 + $0x28] sm:$0xff] }
  0x3b   : > { %v914_v6 = vpop.eup %913  ;;  %929 = vlog2.f32 %v550_v42  ;;  %v377_v21 = vsub.f32 %v1235_v24, %v1240_v44  ;;  %v380_v17 = vmul.f32 %v372_v46, %v372_v46  ;;  %v381_v61 = vmul.f32 %v373_v48, %v373_v48 }
  0x3c   : > { %v916_v58 = vpop.eup %915  ;;  %931 = vlog2.f32 %v551_v13  ;;  %v722_v59 = vadd.f32 %v711_v55, %v710_v51  ;;  %v1255_v60 = vmul.f32 0.6931472, %v914_v6  ;;  %v392_v27 = vmul.f32 %v376_v10, %v376_v10 }
  0x3d   : > { %v918_v62 = vpop.eup %917  ;;  %v670_v63 = vadd.f32 1.0, %v916_v58  ;;  %v384_v50 = vmul.f32 22.222221, %v380_v17  ;;  %v393_v28 = vmul.f32 %v377_v21, %v377_v21  ;;  %v385_v35 = vmul.f32 22.222221, %v381_v61 }
  0x3e   : > { %v920_v0 = vpop.eup %919  ;;  %v671_v1 = vadd.f32 1.0, %v918_v62  ;;  %723 = vadd.xlane.f32.xlu1 %v722_v59  ;;  %v482_v4 = vunpack.c.l.bf16 %v1253_v22  ;;  %v483_v5 = vunpack.c.h.bf16 %v1253_v22  ;;  %v396_v31 = vmul.f32 22.222221, %v392_v27 }
  0x3f   : > { %v922_v16 = vpop.eup %921  ;;  %933 = vlog2.f32 %v670_v63  ;;  %v1263_v20 = vmul.f32 0.6931472, %v920_v0  ;;  %v1266_v45 = vsub.f32 %v1255_v60, %v384_v50  ;;  %v397_v15 = vmul.f32 22.222221, %v393_v28  ;;  %v605_v28 = vld [vmem:[%s1038_s10 + $0x28] sm:$0xff] }
  0x40   : > { %v924_v37 = vpop.eup %923  ;;  %935 = vlog2.f32 %v671_v1  ;;  %v1271_v14 = vmul.f32 0.6931472, %v922_v16  ;;  %v1273_v39 = vunpack.c.l.bf16 %v485_v34  ;;  %v1283_v42 = vunpack.c.h.bf16 %v485_v34 }
  0x41   : > { %v1278_v41 = vmul.f32 0.6931472, %v924_v37  ;;  %v1281_v49 = vsub.f32 %v1263_v20, %v385_v35  ;;  %v492_v46 = vsub.f32 %v1259_v52, %v482_v4  ;;  %v642_v48 = vmax.f32 %v1151_v43, %v1172_v2 }
  0x42   : > { %v643_v13 = vmax.f32 %v1162_v56, %v1175_v8  ;;  %v1293_v51 = vsub.f32 %v1271_v14, %v396_v31  ;;  %v493_v55 = vsub.f32 %v1269_v36, %v483_v5  ;;  %v496_v21 = vsub.f32 %v1259_v52, %v1273_v39 }
  0x43   : > { %v926_v6 = vpop.eup %925  ;;  %v1299_v10 = vsub.f32 %v1278_v41, %v397_v15  ;;  %v500_v17 = vmul.f32 %v492_v46, %v492_v46  ;;  %v602_v43 = vunpack.c.l.bf16 %v1276_v40  ;;  %v497_v58 = vsub.f32 %v1269_v36, %v1283_v42 }
  0x44   : > { %v928_v2 = vpop.eup %927  ;;  %v435_v56 = vmul.f32 0.6931472, %v926_v6  ;;  %v412_v8 = vsub.f32 %v1266_v45, %v1293_v51  ;;  %v501_v59 = vmul.f32 %v493_v55, %v493_v55  ;;  %v603_v27 = vunpack.c.h.bf16 %v1276_v40 }
  0x45   : > { %v930_v61 = vpop.eup %929  ;;  %v437_v62 = vmul.f32 0.6931472, %v928_v2  ;;  %v413_v63 = vsub.f32 %v1281_v49, %v1299_v10  ;;  %v504_v50 = vmul.f32 22.222221, %v500_v17  ;;  %v1331_v17 = vld [vmem:[%s1022_s29 + $0x50] sm:$0xff]  ;;  %v1334_v2 = vld [vmem:[%s1022_s29 + $0x58] sm:$0xff]  ;;  %v1341_v38 = vunpack.c.h.bf16 %v605_v28 }
  0x46   : > { %v932_v34 = vpop.eup %931  ;;  %v442_v0 = vadd.f32 %v435_v56, %v402_v47  ;;  %v555_v1 = vmul.f32 0.6931472, %v930_v61  ;;  %v416_v35 = vand.u32 2147483647, %v412_v8  ;;  %v505_v16 = vmul.f32 22.222221, %v501_v59 }
  0x47   : > { %v443_v31 = vadd.f32 %v437_v62, %v403_v12  ;;  %v557_v37 = vmul.f32 0.6931472, %v932_v34  ;;  %v417_v15 = vand.u32 2147483647, %v413_v63  ;;  %v1319_v46 = vsub.f32 %v1255_v60, %v504_v50 }
  0x48   : > { %v526_v55 = vadd.f32 %v522_v7, %v442_v0  ;;  %v420_v19 = vsub.f32 0.0, %v416_v35  ;;  %v1325_v32 = vsub.f32 %v1263_v20, %v505_v16  ;;  %v512_v47 = vmul.f32 %v496_v21, %v496_v21 }
  0x49   : > { %v934_v6 = vpop.eup %933  ;;  %v527_v26 = vadd.f32 %v523_v18, %v443_v31  ;;  %v421_v11 = vsub.f32 0.0, %v417_v15  ;;  %v513_v12 = vmul.f32 %v497_v58, %v497_v58  ;;  %v1336_v56 = vunpack.c.l.bf16 %v605_v28 }
  0x4a   : > { %v936_v23 = vpop.eup %935  ;;  %v562_v33 = vadd.f32 %v555_v1, %v526_v55  ;;  %v675_v7 = vmul.f32 0.6931472, %v934_v6  ;;  %v426_v8 = vmul.f32 1.442695, %v420_v19  ;;  %v516_v59 = vmul.f32 22.222221, %v512_v47 }
  0x4b   : > { %v563_v61 = vadd.f32 %v557_v37, %v527_v26  ;;  %v677_v21 = vmul.f32 0.6931472, %v936_v23  ;;  %v428_v62 = vmul.f32 1.442695, %v421_v11  ;;  %v517_v63 = vmul.f32 22.222221, %v513_v12 }
  0x4c   : > { %v646_v50 = vadd.f32 %v642_v48, %v562_v33  ;;  %937 = vpow2.f32 %v426_v8  ;;  %v1339_v29 = vsub.f32 %v1271_v14, %v516_v59  ;;  %v612_v34 = vsub.f32 %v1331_v17, %v602_v43 }
  0x4d   : > { %v647_v18 = vadd.f32 %v643_v13, %v563_v61  ;;  %939 = vpow2.f32 %v428_v62  ;;  %v1344_v58 = vsub.f32 %v1278_v41, %v517_v63  ;;  %v613_v48 = vsub.f32 %v1334_v2, %v603_v27 }
  0x4e   : > { %v682_v0 = vadd.f32 %v675_v7, %v646_v50  ;;  %v532_v1 = vsub.f32 %v1319_v46, %v1339_v29  ;;  %v616_v28 = vsub.f32 %v1331_v17, %v1336_v56  ;;  %v617_v31 = vsub.f32 %v1334_v2, %v1341_v38 }
  0x4f   : > { %v683_v35 = vadd.f32 %v677_v21, %v647_v18  ;;  %v533_v13 = vsub.f32 %v1325_v32, %v1344_v58  ;;  %v620_v37 = vmul.f32 %v612_v34, %v612_v34  ;;  %v621_v15 = vmul.f32 %v613_v48, %v613_v48 }
  0x50   : > { %v536_v16 = vand.u32 2147483647, %v532_v1  ;;  %v632_v47 = vmul.f32 %v616_v28, %v616_v28  ;;  %v448_v6 = vsub.f32 %v362_v9, %v1238_v25  ;;  %v633_v23 = vmul.f32 %v617_v31, %v617_v31 }
  0x51   : > { %v714_v55 = vadd.f32 %v683_v35, %v682_v0  ;;  %v537_v19 = vand.u32 2147483647, %v533_v13  ;;  %v624_v11 = vmul.f32 22.222221, %v620_v37  ;;  %v625_v12 = vmul.f32 22.222221, %v621_v15 }
  0x52   : > { %v540_v26 = vsub.f32 0.0, %v536_v16  ;;  %v636_v7 = vmul.f32 22.222221, %v632_v47  ;;  %v449_v8 = vsub.f32 %v363_v54, %v1240_v44  ;;  %v452_v59 = vmul.f32 %v448_v6, %v1088_v30 }
  0x53   : > { %715 = vadd.xlane.f32.xlu0 %v714_v55  ;;  %v541_v33 = vsub.f32 0.0, %v537_v19  ;;  %v1368_v21 = vsub.f32 %v1255_v60, %v624_v11  ;;  %v1371_v9 = vsub.f32 %v1263_v20, %v625_v12  ;;  %v637_v62 = vmul.f32 22.222221, %v633_v23 }
  0x54   : > { %v546_v61 = vmul.f32 1.442695, %v540_v26  ;;  %v1374_v50 = vsub.f32 %v1271_v14, %v636_v7  ;;  %v453_v18 = vmul.f32 %v449_v8, %v1199_v57  ;;  %v456_v3 = vadd.f32 %v452_v59, %v1238_v25 }
  0x55   : > { %v548_v63 = vmul.f32 1.442695, %v541_v33  ;;  %v1379_v34 = vsub.f32 %v1278_v41, %v637_v62  ;;  %v568_v60 = vsub.f32 %v482_v4, %v1273_v39  ;;  %v569_v20 = vsub.f32 %v483_v5, %v1283_v42 }
  0x56   : > { %v938_v54 = vpop.eup %937  ;;  %941 = vpow2.f32 %v546_v61  ;;  %v652_v25 = vsub.f32 %v1368_v21, %v1374_v50  ;;  %460 = vst [vmem:[%s1169_s13 + $0x30] sm:$0xff] %v456_v3  ;;  %v457_v48 = vadd.f32 %v453_v18, %v1240_v44  ;;  %v464_v22 = vsub.f32 %v456_v3, %v1232_v53 }
  0x57   : > { %v940_v14 = vpop.eup %939  ;;  %v432_v0 = vadd.f32 1.0, %v938_v54  ;;  %943 = vpow2.f32 %v548_v63  ;;  %v653_v41 = vsub.f32 %v1371_v9, %v1379_v34  ;;  %v572_v5 = vmul.f32 %v568_v60, %v1088_v30 }
  0x58   : > { %v433_v1 = vadd.f32 1.0, %v940_v14  ;;  %v656_v4 = vand.u32 2147483647, %v652_v25  ;;  %461 = vst [vmem:[%s1169_s13 + $0x38] sm:$0xff] %v457_v48  ;;  %v465_v13 = vsub.f32 %v457_v48, %v1235_v24  ;;  %v573_v28 = vmul.f32 %v569_v20, %v1199_v57 }
  0x59   : > { %945 = vlog2.f32 %v432_v0  ;;  %v657_v35 = vand.u32 2147483647, %v653_v41  ;;  %v576_v31 = vadd.f32 %v572_v5, %v1273_v39  ;;  %v688_v44 = vsub.f32 %v602_v43, %v1336_v56 }
  0x5a   : > { %947 = vlog2.f32 %v433_v1  ;;  %v660_v16 = vsub.f32 0.0, %v656_v4  ;;  %v577_v53 = vadd.f32 %v573_v28, %v1283_v42  ;;  %v689_v15 = vsub.f32 %v603_v27, %v1341_v38 }
  0x5b   : > { %v661_v37 = vsub.f32 0.0, %v657_v35  ;;  %v468_v19 = vmul.f32 %v464_v22, %v464_v22  ;;  %580 = vst [vmem:[%s1169_s13 + $0x40] sm:$0xff] %v576_v31  ;;  %v584_v24 = vsub.f32 %v576_v31, %v1259_v52  ;;  %v692_v47 = vmul.f32 %v688_v44, %v1088_v30 }
  0x5c   : > { %v666_v55 = vmul.f32 1.442695, %v660_v16  ;;  %v469_v6 = vmul.f32 %v465_v13, %v465_v13  ;;  %581 = vst [vmem:[%s1169_s13 + $0x48] sm:$0xff] %v577_v53  ;;  %v585_v43 = vsub.f32 %v577_v53, %v1269_v36  ;;  %v693_v42 = vmul.f32 %v689_v15, %v1199_v57 }
  0x5d   : > { %v668_v39 = vmul.f32 1.442695, %v661_v37  ;;  %v588_v26 = vmul.f32 %v584_v24, %v584_v24  ;;  %v696_v40 = vadd.f32 %v692_v47, %v1336_v56  ;;  %v405_v18 = vmax.f32 %v1281_v49, %v1299_v10 }
  0x5e   : > { %949 = vpow2.f32 %v666_v55  ;;  %v589_v11 = vmul.f32 %v585_v43, %v585_v43  ;;  %v697_v52 = vadd.f32 %v693_v42, %v1341_v38  ;;  %v404_v38 = vmax.f32 %v1266_v45, %v1293_v51 }
  0x5f   : > { %951 = vpow2.f32 %v668_v39  ;;  %v592_v23 = vadd.f32 %v588_v26, %v468_v19  ;;  %700 = vst [vmem:[%s1169_s13 + $0x50] sm:$0xff] %v696_v40  ;;  %v704_v33 = vsub.f32 %v696_v40, %v1331_v17  ;;  %v525_v25 = vmax.f32 %v1325_v32, %v1344_v58 }
  0x60   : > { %v942_v27 = vpop.eup %941  ;;  %v593_v36 = vadd.f32 %v589_v11, %v469_v6  ;;  %701 = vst [vmem:[%s1169_s13 + $0x58] sm:$0xff] %v697_v52  ;;  %v705_v57 = vsub.f32 %v697_v52, %v1334_v2  ;;  %v524_v2 = vmax.f32 %v1319_v46, %v1339_v29  ;;  %v644_v46 = vmax.f32 %v1368_v21, %v1374_v50 }
  0x61   : > { %v944_v12 = vpop.eup %943  ;;  %v552_v30 = vadd.f32 1.0, %v942_v27  ;;  %v708_v59 = vmul.f32 %v704_v33, %v704_v33  ;;  %v645_v32 = vmax.f32 %v1371_v9, %v1379_v34  ;;  %v728_v53 = vlaneseq }
  0x62   : > { %v553_v7 = vadd.f32 1.0, %v944_v12  ;;  %v709_v61 = vmul.f32 %v705_v57, %v705_v57 }
  0x63   : > { %v946_v8 = vpop.eup %945  ;;  %953 = vlog2.f32 %v552_v30  ;;  %v712_v63 = vadd.f32 %v708_v59, %v592_v23  ;;  %v729_v15 = vand.u32 127, %v728_v53 }
  0x64   : > { %v948_v56 = vpop.eup %947  ;;  %955 = vlog2.f32 %v553_v7  ;;  %v439_v62 = vmul.f32 0.6931472, %v946_v8  ;;  %v713_v3 = vadd.f32 %v709_v61, %v593_v36 }
  0x65   : > { %v441_v17 = vmul.f32 0.6931472, %v948_v56  ;;  %vm731_vm0 = vcmp.eq.s32.totalorder %v729_v15, 1  ;;  %vm730_vm1 = vcmp.eq.s32.totalorder %v729_v15, 0 }
  0x66   : > { %v725_v54 = vadd.f32 %v713_v3, %v712_v63  ;;  %v444_v20 = vadd.f32 %v439_v62, %v404_v38 }
  0x67   : > { %v445_v0 = vadd.f32 %v441_v17, %v405_v18 }
  0x68   : > { %v950_v60 = vpop.eup %949  ;;  %726 = vadd.xlane.f32.xlu1 %v725_v54  ;;  %v528_v41 = vadd.f32 %v524_v2, %v444_v20 }
  0x69   : > { %v952_v14 = vpop.eup %951  ;;  %v672_v1 = vadd.f32 1.0, %v950_v60  ;;  %v529_v10 = vadd.f32 %v525_v25, %v445_v0 }
  0x6a   : > { %v673_v45 = vadd.f32 1.0, %v952_v14 }
  0x6b   : > { %957 = vlog2.f32 %v672_v1 }
  0x6c   : > { %959 = vlog2.f32 %v673_v45 }
  0x6d   : > { %v954_v51 = vpop.eup %953 }
  0x6e   : > { %v956_v49 = vpop.eup %955  ;;  %v559_v48 = vmul.f32 0.6931472, %v954_v51 }
  0x6f   : > { %v561_v4 = vmul.f32 0.6931472, %v956_v49 }
  0x70   : > { %v564_v22 = vadd.f32 %v559_v48, %v528_v41 }
  0x71   : > { %v565_v29 = vadd.f32 %v561_v4, %v529_v10 }
  0x72   : > { %v648_v58 = vadd.f32 %v644_v46, %v564_v22 }
  0x73   : > { %v649_v35 = vadd.f32 %v645_v32, %v565_v29 }
  0x75   : > { %v958_v5 = vpop.eup %957 }
  0x76   : > { %v960_v13 = vpop.eup %959  ;;  %v679_v28 = vmul.f32 0.6931472, %v958_v5 }
  0x77   : > { %v681_v16 = vmul.f32 0.6931472, %v960_v13 }
  0x78   : > { %v684_v31 = vadd.f32 %v679_v28, %v648_v58 }
  0x79   : > { %v685_v44 = vadd.f32 %v681_v16, %v649_v35 }
  0x7b   : > { %v717_v37 = vadd.f32 %v685_v44, %v684_v31 }
  0x7d   : > { %718 = vadd.xlane.f32.xlu0 %v717_v37 }
  0xcb   : > { %v724_v55 = vpop.xlane.xlu1 %723 }
  0xcc   : > { %v732_v50 = vsel %vm731_vm0, %v724_v55, 0.0 }
  0xe0   : > { %v716_v21 = vpop.xlane.xlu0 %715 }
  0xe1   : > { %v720_v19 = vadd.f32 751.24335, %v716_v21 }
  0xe3   : > { %v734_v9 = vsel %vm730_vm1, %v720_v19, %v732_v50 }
  0xe4   : > { %736 = vst [vmem:[%s320_s17] sm:$0xff] %v734_v9 }
  0xf5   : > { %v727_v34 = vpop.xlane.xlu1 %726 }
  0xf6   : > { %v733_v47 = vsel %vm731_vm0, %v727_v34, 0.0 }
 0x10a   : > { %v719_v24 = vpop.xlane.xlu0 %718 }
 0x10b   : > { %v721_v39 = vadd.f32 751.24335, %v719_v24 }
 0x10d   : > { %v735_v6 = vsel %vm730_vm1, %v721_v39, %v733_v47 }
 0x10e   : > { %737 = vst [vmem:[%s320_s17 + $0x8] sm:$0xff] %v735_v6 }
 0x10f PF: > { %s16_s18 = sadd.s32 1, %s967_s18  }
 0x110   : > { %p13_p4 = scmp.ge.s32.totalorder %s16_s18, 4  }
 0x112   :  { %15 = sbr.rel (!%p13_p4) target bundleno = 1 (0x1), region = 87 }

</bundles_post_ra>
